<compile_context>
chip_gen: v7x
topology: tpu7x:2x2x1
jax: 0.10.0
libtpu: 0.0.40
codegen_flags: <defaults>
</compile_context>

<pallas_src>
import jax
import jax.numpy as jnp
from jax.experimental import pallas as pl
from jax.experimental.pallas import tpu as pltpu


def _fc_kernel(w_ref, b_ref, x_ref, o_ref):
    """w_ref: (dim_out, C), b_ref: (dim_out, 1), x_ref: (C, TF), o_ref: (dim_out, TF)."""
    out = jnp.dot(w_ref[...], x_ref[...], preferred_element_type=jnp.float32)
    out = out + b_ref[...].astype(jnp.float32)
    o_ref[...] = out.astype(o_ref.dtype)


def _collapse_affine(weights, biases):
    """Fold an activation-free Linear chain into one (C, dim) weight + (dim,) bias.

    weights are in (in, out) layout (already transposed from torch's (out, in)).
    h = (...((x@W0 + b0)@W1 + b1)...)  ==  x @ (W0@W1@...) + (b0@W1@... + ...)
    """
    w_total = weights[0]
    b_total = biases[0]
    for w, b in zip(weights[1:], biases[1:]):
        b_total = b_total @ w + b
        w_total = w_total @ w
    return w_total, b_total


def fc_forward(x, weights, biases, *, f_tile=512):
    """Pallas implementation of _FC.forward.

    x       : (N, C, F) array
    weights : list of (in_l, out_l) arrays (transposed from torch (out, in))
    biases  : list of (out_l,) arrays
    returns : (N, dim, F) array
    """
    N, C, F = x.shape
    w_total, b_total = _collapse_affine(weights, biases)
    dim_out = w_total.shape[1]
    wt = jnp.transpose(w_total)          # (dim_out, C)   -- tiny, resident
    bt = b_total.reshape(dim_out, 1)     # (dim_out, 1)

    # Lane-dense tiling of the frame axis: pad F to a multiple of the tile,
    # tile is a multiple of 128 lanes (unmasked vst) capped at f_tile.
    f_pad = ((F + 127) // 128) * 128
    tf = min(f_tile, f_pad)
    f_pad = ((f_pad + tf - 1) // tf) * tf
    if f_pad != F:
        x = jnp.pad(x, ((0, 0), (0, 0), (0, f_pad - F)))

    grid = (N, f_pad // tf)
    out = pl.pallas_call(
        _fc_kernel,
        out_shape=jax.ShapeDtypeStruct((N, dim_out, f_pad), x.dtype),
        grid=grid,
        in_specs=[
            pl.BlockSpec((dim_out, C), lambda n, f: (0, 0)),      # resident weight
            pl.BlockSpec((dim_out, 1), lambda n, f: (0, 0)),      # resident bias
            pl.BlockSpec((None, C, tf), lambda n, f: (n, 0, f)),  # activation tile
        ],
        out_specs=pl.BlockSpec((None, dim_out, tf), lambda n, f: (n, 0, f)),
        compiler_params=pltpu.CompilerParams(
            dimension_semantics=("parallel", "parallel")),
    )(wt, bt, x)

    if f_pad != F:
        out = out[:, :, :F]
    return out


def init_fc_params(key, dim, num_f_maps, num_ssl_layers, num_ssl_f_maps,
                   dtype=jnp.float32):
    """Deterministic parameter init mimicking nn.Linear defaults.

    Returns weights as (in, out) (transposed from PyTorch's (out, in)) and
    biases as (out,).
    """
    sizes = [(num_f_maps, num_ssl_f_maps)]
    for _ in range(num_ssl_layers - 2):
        sizes.append((num_ssl_f_maps, num_ssl_f_maps))
    sizes.append((num_ssl_f_maps, dim))

    weights, biases = [], []
    for (fan_in, fan_out) in sizes:
        key, kw, kb = jax.random.split(key, 3)
        bound = 1.0 / jnp.sqrt(jnp.asarray(fan_in, dtype=jnp.float32))
        w = jax.random.uniform(kw, (fan_in, fan_out), dtype=dtype,
                               minval=-bound, maxval=bound)
        b = jax.random.uniform(kb, (fan_out,), dtype=dtype,
                               minval=-bound, maxval=bound)
        weights.append(w)
        biases.append(b)
    return weights, biases


def fc_forward_ref(x, weights, biases):
    """Pure-JAX reference of _FC.forward (layer-by-layer, for correctness)."""
    N, C, F = x.shape
    h = jnp.transpose(x, (0, 2, 1)).reshape(N * F, C)
    for w, b in zip(weights, biases):
        h = h @ w + b
    dim_out = weights[-1].shape[1]
    return jnp.transpose(h.reshape(N, F, dim_out), (0, 2, 1))


if __name__ == "__main__":
    # Module hyper-params (consistent with _FC.__init__)
    dim = 6            # output number of features
    num_f_maps = 4     # input channels C
    num_ssl_layers = 3
    num_ssl_f_maps = 32

    # Input: (N, C, F) = (batch, num_f_maps, frames)
    N, F = 2, 16
    key = jax.random.PRNGKey(0)
    key, kx = jax.random.split(key)
    x = jax.random.normal(kx, (N, num_f_maps, F), dtype=jnp.float32)

    weights, biases = init_fc_params(
        key, dim, num_f_maps, num_ssl_layers, num_ssl_f_maps)

    y = jax.block_until_ready(fc_forward(x, weights, biases))
    y_ref = fc_forward_ref(x, weights, biases)

    assert y.shape == (N, dim, F), y.shape
    # Collapsed affine chain differs from layer-by-layer only by f32 reassociation.
    assert jnp.allclose(y, y_ref, atol=1e-5, rtol=1e-5), "mismatch vs reference"

    print("KERNEL_OK")
</pallas_src>

<mosaic_0001>
module attributes {stable_mosaic.version = 11 : i64} {
  func.func @_fc_kernel(%arg0: i32, %arg1: i32, %arg2: memref<6x4xf32, #tpu.memory_space<vmem>>, %arg3: memref<6x1xf32, #tpu.memory_space<vmem>>, %arg4: memref<1x4x128xf32, #tpu.memory_space<vmem>>, %arg5: memref<1x6x128xf32, #tpu.memory_space<vmem>>) attributes {dimension_semantics = [#tpu.dimension_semantics<parallel>, #tpu.dimension_semantics<parallel>], iteration_bounds = array<i64: 2, 1>, scalar_prefetch = 0 : i64, scratch_operands = 0 : i64, tpu.core_type = #tpu.core_type<tc>, window_params = [{pipeline_mode = #tpu.pipeline_mode<synchronous>, transform_indices = @transform_0, window_bounds = array<i64: 6, 4>}, {pipeline_mode = #tpu.pipeline_mode<synchronous>, transform_indices = @transform_1, window_bounds = array<i64: 6, 1>}, {transform_indices = @transform_2, window_bounds = array<i64: 1, 4, 128>}, {transform_indices = @transform_3, window_bounds = array<i64: 1, 6, 128>}]} {
    %c0 = arith.constant 0 : index
    %c0_0 = arith.constant 0 : index
    %0 = vector.load %arg2[%c0, %c0_0] : memref<6x4xf32, #tpu.memory_space<vmem>>, vector<6x4xf32>
    %c0_1 = arith.constant 0 : index
    %c0_2 = arith.constant 0 : index
    %c0_3 = arith.constant 0 : index
    %1 = vector.load %arg4[%c0_1, %c0_2, %c0_3] : memref<1x4x128xf32, #tpu.memory_space<vmem>>, vector<1x4x128xf32>
    %2 = vector.shape_cast %1 : vector<1x4x128xf32> to vector<4x128xf32>
    %cst = arith.constant dense<0.000000e+00> : vector<6x128xf32>
    %3 = tpu.matmul %0, %2, %cst {dimension_numbers = #tpu.dot_dimension_numbers<[1], [0], [0], [1], [0, 0, 1, 1], [], []>} : vector<6x4xf32>, vector<4x128xf32>, vector<6x128xf32> -> vector<6x128xf32>
    %c0_4 = arith.constant 0 : index
    %c0_5 = arith.constant 0 : index
    %4 = vector.load %arg3[%c0_4, %c0_5] : memref<6x1xf32, #tpu.memory_space<vmem>>, vector<6x1xf32>
    %5 = vector.broadcast %4 : vector<6x1xf32> to vector<6x128xf32>
    %6 = arith.addf %3, %5 : vector<6x128xf32>
    %c0_6 = arith.constant 0 : index
    %c0_7 = arith.constant 0 : index
    %c0_8 = arith.constant 0 : index
    %7 = vector.load %arg5[%c0_6, %c0_7, %c0_8] : memref<1x6x128xf32, #tpu.memory_space<vmem>>, vector<1x6x128xf32>
    %8 = vector.shape_cast %7 : vector<1x6x128xf32> to vector<6x128xf32>
    %9 = vector.shape_cast %6 : vector<6x128xf32> to vector<1x6x128xf32>
    tpu.vector_store %arg5[%c0_6, %c0_7, %c0_8], %9 {strides = array<i32>} : memref<1x6x128xf32, #tpu.memory_space<vmem>>, vector<1x6x128xf32>,
    return
  }
  func.func @transform_0(%arg0: i32, %arg1: i32) -> (i32, i32) {
    %c0_i32 = arith.constant 0 : i32
    %c0_i32_0 = arith.constant 0 : i32
    %c0_i32_1 = arith.constant 0 : i32
    return %c0_i32, %c0_i32_0 : i32, i32
  }
  func.func @transform_1(%arg0: i32, %arg1: i32) -> (i32, i32) {
    %c0_i32 = arith.constant 0 : i32
    %c0_i32_0 = arith.constant 0 : i32
    %c0_i32_1 = arith.constant 0 : i32
    return %c0_i32, %c0_i32_0 : i32, i32
  }
  func.func @transform_2(%arg0: i32, %arg1: i32) -> (i32, i32, i32) {
    %c0_i32 = arith.constant 0 : i32
    %c0_i32_0 = arith.constant 0 : i32
    return %arg0, %c0_i32, %arg1 : i32, i32, i32
  }
  func.func @transform_3(%arg0: i32, %arg1: i32) -> (i32, i32, i32) {
    %c0_i32 = arith.constant 0 : i32
    %c0_i32_0 = arith.constant 0 : i32
    return %arg0, %c0_i32, %arg1 : i32, i32, i32
  }
}

</mosaic_0001>

<bundles_post_ra>
// kernel: tpu_custom_call.1
= control target key start
LH: loop header
LB: loop body
LE: loop exit
PB: predicated region body
PF: predicated region fallthrough
CT: control target
= control target key end

     0   :  { %s451_s12 = smov 0   ;;  %s453_s13 = smov 0   ;;  %s490_s0 = inlined_call_operand.vmem [shape: f32[6,4], index: 0, kind: input, shape index: {}]   ;;  %s491_s1 = inlined_call_operand.vmem [shape: f32[6,1], index: 1, kind: input, shape index: {}]   ;;  %s492_s2 = inlined_call_operand.vmem [shape: f32[2,4,128], index: 2, kind: input, shape index: {}]   ;;  %s493_s3 = inlined_call_operand.vmem [shape: f32[2,6,128], index: 3, kind: output, shape index: {}]  }
   0x1   :  { %s455_s14 = smov 0  }
   0x2 LB: > { %s25_s15 = sadd.s32 1, %s422_s13  ;;  %p362_p0 = scmp.ge.s32.totalorder %s426_s14, 1  ;;  %s426_s14 = sphi %s455_s14, %s13_s14   ;;  %s422_s13 = sphi %s453_s13, %s495_s13   ;;  %s418_s12 = sphi %s451_s12, %s494_s12  }
   0x3   : > { %p27_p1 = scmp.ge.s32.totalorder %s25_s15, 2  ;;  %p155_p2 = scmp.lt.s32.totalorder %s426_s14, 3 }
   0x5   : > { %s497_s15 = smov (%p27_p1, %s25_s15), 0  ;;  %p156_p3 = pnand %p362_p0, %p155_p2 }
   0x6   : > { %p183_p4 = scmp.lt.s32.totalorder (!%p156_p3), %s418_s12, 1  ;;  %v428_v0 = vmov (!%p156_p3), 0.0   ;;  %vm429_vm0 = vmmov (!%p156_p3), 0   ;;  %v199_v1 = vld [vmem:[%s491_s1] sm:$0x3f] (!%p156_p3)  ;;  %v430_v2 = vmov (!%p156_p3), 0  }
   0x7   : > { %159 = sbr.rel (%p156_p3) target bundleno = 234 (0xea), region = 32  ;;  %371 = vmatprep.subr.mxu0 (!%p156_p3), %v428_v0  ;;  %373 = vmatprep.mubr.msk.f32.mxu0 (!%p156_p3), %vm429_vm0, %v428_v0  ;;  %vm209_vm1 = vcmask (!%p156_p3), 1043456   ;;  %v197_v3 = vld [vmem:[%s490_s0] sm:$0x3f] (!%p156_p3)  ;;  %vm205_vm2 = vcmask (!%p156_p3), 31744  }
   0x8   : > { %403 = vset.pattern.permute.xlu0 (!%p156_p3), %v430_v2 }
   0x9   : > { %202 = vperm.xlu0 (!%p156_p3), %403, %v199_v1  }
   0xe   : > { %s499_s12 = smov (!%p183_p4, %s418_s12), 1 }
   0xf   : > { %s363_s18 = sshll.u32 %s499_s12, 2  ;;  %s364_s24 = sshll.u32 %s499_s12, 3 }
  0x10   : > { %s189_s21 = scalar_lea.vmem %s492_s2, %s363_s18  ;;  %s196_s27 = scalar_lea.vmem %s493_s3, %s364_s24 }
  0x11   : > { %v198_v4 = vld [vmem:[%s189_s21] sm:$0xf] }
  0x12   : > { %372 = vmatpush3.msk.msra.mxu0 %vm209_vm1, %v198_v4 }
  0x13   : > { %374 = vmatmul.mubr.msk.f32.vlgmr.msra.gmra.mrb[0].mxu0 %vm205_vm2, %v197_v3 }
  0x88   : > { %v203_v5 = vpop.permute.xlu0 %202 }
  0xe6   : > { %v279_v6 = vpop.f32.mrb[0].mxu0 }
  0xe7   : > { %v280_v7 = vadd.f32 %v279_v6, %v203_v5  ;;  %v375_v8 = vpop.f32.mrb[1].mxu0 }
  0xe9   : > { %283 = vst [vmem:[%s196_s27] sm:$0x3f] %v280_v7 }
  0xea PF: > { %s13_s14 = sadd.s32 1, %s426_s14   ;;  %s494_s12 = smov %s422_s13 }
  0xeb   : > { %p10_p5 = scmp.ge.s32.totalorder %s13_s14, 4   ;;  %s495_s13 = smov %s497_s15 }
  0xed   :  { %12 = sbr.rel (!%p10_p5) target bundleno = 2 (0x2), region = 62 }

</bundles_post_ra>
